<compile_context>
chip_gen: v7x
topology: tpu7x:2x2x1
jax: 0.10.0
libtpu: 0.0.40
codegen_flags: <defaults>
</compile_context>

<pallas_src>
import functools

import numpy as np
import jax
import jax.numpy as jnp
from jax.experimental import pallas as pl
from jax.experimental.pallas import tpu as pltpu


# ----------------------------------------------------------------------------
# Host-side helpers: 1-D resampling matrices (trace-time numpy constants)
# ----------------------------------------------------------------------------
def bilinear_matrix(out_size, in_size):
    """Row-interp matrix matching F.interpolate(mode='bilinear', align_corners=True)."""
    A = np.zeros((out_size, in_size), dtype=np.float32)
    if out_size == 1 or in_size == 1:
        A[:, 0] = 1.0
        return A
    scale = (in_size - 1) / (out_size - 1)
    for i in range(out_size):
        y = i * scale
        y0 = int(np.floor(y))
        y1 = min(y0 + 1, in_size - 1)
        wy = y - y0
        A[i, y0] += 1.0 - wy
        A[i, y1] += wy
    return A


def adaptive_avg_matrix(out_size, in_size):
    """Row-pooling matrix matching nn.AdaptiveAvgPool2d along one axis."""
    A = np.zeros((out_size, in_size), dtype=np.float32)
    for i in range(out_size):
        start = (i * in_size) // out_size
        end = -(-((i + 1) * in_size) // out_size)  # ceil
        A[i, start:end] = 1.0 / (end - start)
    return A


# ----------------------------------------------------------------------------
# Fused kernel.  Layout: rows = channels/features, lanes = batch-blocked spatial.
#   x_ref    : (2C+1, N*HW)      bf16   [src channels ; ref channels ; mask]
#   pcat_ref : (N*HW, 2*N*FHW)   bf16   [blockdiag(avg-down) | blockdiag(bilinear)]
#   pout_ref : (N*FHW, N*OHW)    bf16   blockdiag(bilinear-up (+ adaptive pool))
#   w_ref    : (2F+OUTC, max(2C+1, F+1)) f32  packed weights/biases
#   out_ref  : (OUTC, N*OHW)     f32    lane-dense output
# ----------------------------------------------------------------------------
def _reference_fill_kernel(x_ref, pcat_ref, pout_ref, w_ref, out_ref, *,
                           n2c, nfhw, feat, outc, leaky_slope):
    # One matmul: downsampled src+ref channels AND bilinearly resampled mask.
    x_ds = jnp.dot(x_ref[...], pcat_ref[...],
                   preferred_element_type=jnp.float32)        # (2C+1, 2*N*FHW)
    imgs = x_ds[:n2c, :nfhw]                                  # (2C, N*FHW)
    m = x_ds[n2c:n2c + 1, nfhw:2 * nfhw]                      # (1,  N*FHW)

    w = w_ref[...]                                            # packed weights
    w_bd = w[:2 * feat, :n2c]                                 # (2F, 2C) block-diag conv
    b_bd = w[:2 * feat, n2c:n2c + 1]                          # (2F, 1)
    w_dec = w[2 * feat:2 * feat + outc, :feat]                # (OUTC, F)
    b_dec = w[2 * feat:2 * feat + outc, feat:feat + 1]        # (OUTC, 1)

    # Both 1x1 convs in one matmul (block-diagonal weight), then LeakyReLU.
    feats = jnp.dot(w_bd, imgs, preferred_element_type=jnp.float32) + b_bd  # (2F, N*FHW)
    feats = jnp.maximum(feats, leaky_slope * feats)           # LeakyReLU, 0 < slope < 1

    src_feat = feats[:feat]                                   # (F, N*FHW)
    ref_feat = feats[feat:2 * feat]                           # (F, N*FHW)

    # use_att=False blend: (1-m)*src + m*ref  ==  src + m*(ref-src)
    blended = src_feat + m * (ref_feat - src_feat)            # (F, N*FHW), f32

    # Synthetic decoder: 1x1 conv to RGB then fused bilinear-up (+ adaptive pool).
    dec = jnp.dot(w_dec, blended, preferred_element_type=jnp.float32) + b_dec  # (OUTC, N*FHW)
    out_ref[...] = jnp.dot(dec.astype(jnp.bfloat16), pout_ref[...],
                           preferred_element_type=jnp.float32)                 # (OUTC, N*OHW)


# ----------------------------------------------------------------------------
# Parameters (synthetic stand-ins for the real encoder/decoder sub-networks)
# ----------------------------------------------------------------------------
def init_params(key, in_ch=3, img_f=32, out_ch=3):
    k1, k2, k3, k4, k5, k6 = jax.random.split(key, 6)
    scale = 0.1
    return {
        "src_enc_w": scale * jax.random.normal(k1, (in_ch, img_f), jnp.float32),
        "src_enc_b": scale * jax.random.normal(k2, (img_f,), jnp.float32),
        "ref_enc_w": scale * jax.random.normal(k3, (in_ch, img_f), jnp.float32),
        "ref_enc_b": scale * jax.random.normal(k4, (img_f,), jnp.float32),
        "dec_w": scale * jax.random.normal(k5, (img_f, out_ch), jnp.float32),
        "dec_b": scale * jax.random.normal(k6, (out_ch,), jnp.float32),
    }


# ----------------------------------------------------------------------------
# ReferenceFill forward (use_att=False path) — one pallas_call, no grid.
# ----------------------------------------------------------------------------
@functools.partial(jax.jit, static_argnames=("out_size", "resize"))
def reference_fill_forward(params, src_image, ref_image, src_mask,
                           out_size=(8, 8), resize=True):
    """src_image, ref_image: (N, 3, H, W); src_mask: (N, H, W)."""
    N, C, H, W = src_image.shape
    fh, fw = max(H // 4, 1), max(W // 4, 1)        # encoder feature resolution
    HW, FHW = H * W, fh * fw
    F = params["src_enc_w"].shape[1]
    OUTC = params["dec_w"].shape[1]

    # --- trace-time resampling matrices (separable 1-D -> Kronecker) ---
    penc = np.kron(adaptive_avg_matrix(fh, H), adaptive_avg_matrix(fw, W))    # (FHW, HW)
    pmask = np.kron(bilinear_matrix(fh, H), bilinear_matrix(fw, W))           # (FHW, HW)
    p_up = np.kron(bilinear_matrix(H, fh), bilinear_matrix(W, fw))            # (HW, FHW)
    if resize:
        oh, ow = out_size
        p_out = np.kron(adaptive_avg_matrix(oh, H), adaptive_avg_matrix(ow, W)) @ p_up
        out_h, out_w = oh, ow
    else:
        p_out = p_up
        out_h, out_w = H, W
    OHW = out_h * out_w
    # Decoder bias is added BEFORE this resampling matmul; exact only because
    # every row of the composed resampling matrix sums to 1.
    assert np.allclose(p_out.sum(axis=1), 1.0, atol=1e-4), \
        "bias-before-resample composition requires row-stochastic resampling"

    # Block-diagonal over batch (batch folded into the lane/spatial dim).
    eye = np.eye(N, dtype=np.float32)
    p_cat = np.concatenate([np.kron(eye, penc.T), np.kron(eye, pmask.T)], axis=1)
    p_out_bd = np.kron(eye, p_out.T)                                          # (N*FHW, N*OHW)
    p_cat = jnp.asarray(p_cat, jnp.bfloat16)                                  # (N*HW, 2*N*FHW)
    p_out_bd = jnp.asarray(p_out_bd, jnp.bfloat16)

    # --- pack [src ; ref ; mask] with batch folded into flattened spatial ---
    src_r = jnp.transpose(src_image, (1, 0, 2, 3)).reshape(C, N * HW)
    ref_r = jnp.transpose(ref_image, (1, 0, 2, 3)).reshape(C, N * HW)
    mask_r = src_mask.reshape(1, N * HW)
    x_all = jnp.concatenate([src_r, ref_r, mask_r], axis=0).astype(jnp.bfloat16)

    # --- pack all weights/biases into one f32 buffer (4 kernel inputs total) ---
    n2c = 2 * C
    wcols = max(n2c + 1, F + 1)
    w_pack = jnp.zeros((2 * F + OUTC, wcols), jnp.float32)
    w_pack = w_pack.at[:F, :C].set(params["src_enc_w"].T)          # src conv (block-diag)
    w_pack = w_pack.at[F:2 * F, C:n2c].set(params["ref_enc_w"].T)  # ref conv (block-diag)
    w_pack = w_pack.at[:F, n2c].set(params["src_enc_b"])
    w_pack = w_pack.at[F:2 * F, n2c].set(params["ref_enc_b"])
    w_pack = w_pack.at[2 * F:, :F].set(params["dec_w"].T)
    w_pack = w_pack.at[2 * F:, F].set(params["dec_b"])

    NHW, NFHW, NOHW = N * HW, N * FHW, N * OHW
    flops = 2 * ((n2c + 1) * NHW * 2 * NFHW        # fused downsample + mask resample
                 + 2 * F * n2c * NFHW              # fused 1x1 convs
                 + OUTC * F * NFHW                 # decoder 1x1 conv
                 + OUTC * NFHW * NOHW)             # fused upsample (+ pool)
    bytes_accessed = int(x_all.size * 2 + p_cat.size * 2 + p_out_bd.size * 2
                         + w_pack.size * 4 + OUTC * NOHW * 4)

    vmem_spec = pl.BlockSpec(memory_space=pltpu.MemorySpace.VMEM)
    out = pl.pallas_call(
        functools.partial(_reference_fill_kernel, n2c=n2c, nfhw=NFHW,
                          feat=F, outc=OUTC, leaky_slope=0.2),
        out_shape=jax.ShapeDtypeStruct((OUTC, NOHW), jnp.float32),
        in_specs=[vmem_spec, vmem_spec, vmem_spec, vmem_spec],
        out_specs=vmem_spec,
        cost_estimate=pl.CostEstimate(flops=int(flops), transcendentals=0,
                                      bytes_accessed=bytes_accessed),
    )(x_all, p_cat, p_out_bd, w_pack)

    # (OUTC, N*OHW) -> (N, OUTC, out_h, out_w)
    return out.reshape(OUTC, N, out_h, out_w).transpose(1, 0, 2, 3)


# ----------------------------------------------------------------------------
# Pure-JAX f32 reference (same synthetic sub-networks) for tolerance checking.
# ----------------------------------------------------------------------------
def _reference_forward_f32(params, src_image, ref_image, src_mask,
                           out_size=(8, 8), resize=True):
    N, C, H, W = src_image.shape
    fh, fw = max(H // 4, 1), max(W // 4, 1)
    HW = H * W
    penc = jnp.asarray(np.kron(adaptive_avg_matrix(fh, H), adaptive_avg_matrix(fw, W)))
    pmask = jnp.asarray(np.kron(bilinear_matrix(fh, H), bilinear_matrix(fw, W)))
    p_up = np.kron(bilinear_matrix(H, fh), bilinear_matrix(W, fw))
    if resize:
        oh, ow = out_size
        p_out = np.kron(adaptive_avg_matrix(oh, H), adaptive_avg_matrix(ow, W)) @ p_up
    else:
        oh, ow = H, W
        p_out = p_up
    p_out = jnp.asarray(p_out)

    def enc(x, w, b):
        xd = x.reshape(N, C, HW) @ penc.T
        y = jnp.einsum('cf,ncs->nfs', w, xd) + b[None, :, None]
        return jnp.where(y > 0, y, 0.2 * y)

    sf = enc(src_image, params["src_enc_w"], params["src_enc_b"])
    rf = enc(ref_image, params["ref_enc_w"], params["ref_enc_b"])
    m = src_mask.reshape(N, 1, HW) @ pmask.T
    blended = (1.0 - m) * sf + m * rf
    dec = (jnp.einsum('fo,nfs->nos', params["dec_w"], blended)
           + params["dec_b"][None, :, None])
    out = dec @ p_out.T
    return out.reshape(N, -1, oh, ow)


if __name__ == "__main__":
    key = jax.random.PRNGKey(0)
    k_src, k_ref, k_mask, k_par = jax.random.split(key, 4)

    N, C, H, W = 2, 3, 16, 16
    img_f = 32
    out_size = (8, 8)

    src_image = jax.random.normal(k_src, (N, C, H, W), jnp.float32)
    ref_image = jax.random.normal(k_ref, (N, C, H, W), jnp.float32)
    src_mask = (jax.random.uniform(k_mask, (N, H, W)) > 0.5).astype(jnp.float32)

    params = init_params(k_par, in_ch=C, img_f=img_f, out_ch=3)

    out = reference_fill_forward(params, src_image, ref_image, src_mask,
                                 out_size=out_size, resize=True)
    out = jax.block_until_ready(out)

    assert out.shape == (N, 3, out_size[0], out_size[1]), out.shape
    assert out.dtype == jnp.float32
    assert bool(jnp.all(jnp.isfinite(out)))

    # Tolerance check vs. the f32 reference (bf16 MXU inputs, f32 accumulation).
    ref_out = _reference_forward_f32(params, src_image, ref_image, src_mask,
                                     out_size=out_size, resize=True)
    assert bool(jnp.allclose(out, ref_out, atol=5e-2, rtol=5e-2)), \
        float(jnp.max(jnp.abs(out - ref_out)))

    print("KERNEL_OK")
</pallas_src>

<mosaic_0001>
module attributes {stable_mosaic.version = 11 : i64} {
  func.func @_reference_fill_kernel(%arg0: memref<7x512xbf16, #tpu.memory_space<vmem>>, %arg1: memref<512x64xbf16, #tpu.memory_space<vmem>>, %arg2: memref<32x128xbf16, #tpu.memory_space<vmem>>, %arg3: memref<67x33xf32, #tpu.memory_space<vmem>>, %arg4: memref<3x128xf32, #tpu.memory_space<vmem>>) attributes {dimension_semantics = [], scalar_prefetch = 0 : i64, scratch_operands = 0 : i64, tpu.core_type = #tpu.core_type<tc>} {
    %c0 = arith.constant 0 : index
    %c0_0 = arith.constant 0 : index
    %0 = vector.load %arg0[%c0, %c0_0] : memref<7x512xbf16, #tpu.memory_space<vmem>>, vector<7x512xbf16>
    %c0_1 = arith.constant 0 : index
    %c0_2 = arith.constant 0 : index
    %1 = vector.load %arg1[%c0_1, %c0_2] : memref<512x64xbf16, #tpu.memory_space<vmem>>, vector<512x64xbf16>
    %cst = arith.constant dense<0.000000e+00> : vector<7x64xf32>
    %2 = tpu.matmul %0, %1, %cst {dimension_numbers = #tpu.dot_dimension_numbers<[1], [0], [0], [1], [0, 0, 1, 1], [], []>} : vector<7x512xbf16>, vector<512x64xbf16>, vector<7x64xf32> -> vector<7x64xf32>
    %3 = vector.extract_strided_slice %2 {offsets = [0, 0], sizes = [6, 32], strides = [1, 1]} : vector<7x64xf32> to vector<6x32xf32>
    %4 = vector.extract_strided_slice %2 {offsets = [6, 32], sizes = [1, 32], strides = [1, 1]} : vector<7x64xf32> to vector<1x32xf32>
    %c0_3 = arith.constant 0 : index
    %c0_4 = arith.constant 0 : index
    %5 = vector.load %arg3[%c0_3, %c0_4] : memref<67x33xf32, #tpu.memory_space<vmem>>, vector<67x33xf32>
    %6 = vector.extract_strided_slice %5 {offsets = [0, 0], sizes = [64, 6], strides = [1, 1]} : vector<67x33xf32> to vector<64x6xf32>
    %7 = vector.extract_strided_slice %5 {offsets = [0, 6], sizes = [64, 1], strides = [1, 1]} : vector<67x33xf32> to vector<64x1xf32>
    %8 = vector.extract_strided_slice %5 {offsets = [64, 0], sizes = [3, 32], strides = [1, 1]} : vector<67x33xf32> to vector<3x32xf32>
    %9 = vector.extract_strided_slice %5 {offsets = [64, 32], sizes = [3, 1], strides = [1, 1]} : vector<67x33xf32> to vector<3x1xf32>
    %cst_5 = arith.constant dense<0.000000e+00> : vector<64x32xf32>
    %10 = tpu.matmul %6, %3, %cst_5 {dimension_numbers = #tpu.dot_dimension_numbers<[1], [0], [0], [1], [0, 0, 1, 1], [], []>} : vector<64x6xf32>, vector<6x32xf32>, vector<64x32xf32> -> vector<64x32xf32>
    %11 = vector.broadcast %7 : vector<64x1xf32> to vector<64x32xf32>
    %12 = arith.addf %10, %11 : vector<64x32xf32>
    %cst_6 = arith.constant 2.000000e-01 : f32
    %13 = vector.broadcast %cst_6 : f32 to vector<64x32xf32>
    %14 = arith.mulf %13, %12 : vector<64x32xf32>
    %15 = arith.maximumf %12, %14 : vector<64x32xf32>
    %16 = vector.extract_strided_slice %15 {offsets = [0, 0], sizes = [32, 32], strides = [1, 1]} : vector<64x32xf32> to vector<32x32xf32>
    %17 = vector.extract_strided_slice %15 {offsets = [32, 0], sizes = [32, 32], strides = [1, 1]} : vector<64x32xf32> to vector<32x32xf32>
    %18 = arith.subf %17, %16 : vector<32x32xf32>
    %19 = vector.broadcast %4 : vector<1x32xf32> to vector<32x32xf32>
    %20 = arith.mulf %19, %18 : vector<32x32xf32>
    %21 = arith.addf %16, %20 : vector<32x32xf32>
    %cst_7 = arith.constant dense<0.000000e+00> : vector<3x32xf32>
    %22 = tpu.matmul %8, %21, %cst_7 {dimension_numbers = #tpu.dot_dimension_numbers<[1], [0], [0], [1], [0, 0, 1, 1], [], []>} : vector<3x32xf32>, vector<32x32xf32>, vector<3x32xf32> -> vector<3x32xf32>
    %23 = vector.broadcast %9 : vector<3x1xf32> to vector<3x32xf32>
    %24 = arith.addf %22, %23 : vector<3x32xf32>
    %25 = arith.truncf %24 : vector<3x32xf32> to vector<3x32xbf16>
    %c0_8 = arith.constant 0 : index
    %c0_9 = arith.constant 0 : index
    %26 = vector.load %arg2[%c0_8, %c0_9] : memref<32x128xbf16, #tpu.memory_space<vmem>>, vector<32x128xbf16>
    %cst_10 = arith.constant dense<0.000000e+00> : vector<3x128xf32>
    %27 = tpu.matmul %25, %26, %cst_10 {dimension_numbers = #tpu.dot_dimension_numbers<[1], [0], [0], [1], [0, 0, 1, 1], [], []>} : vector<3x32xbf16>, vector<32x128xbf16>, vector<3x128xf32> -> vector<3x128xf32>
    %c0_11 = arith.constant 0 : index
    %c0_12 = arith.constant 0 : index
    %28 = vector.load %arg4[%c0_11, %c0_12] : memref<3x128xf32, #tpu.memory_space<vmem>>, vector<3x128xf32>
    tpu.vector_store %arg4[%c0_11, %c0_12], %27 {strides = array<i32>} : memref<3x128xf32, #tpu.memory_space<vmem>>, vector<3x128xf32>,
    return
  }
}

</mosaic_0001>

<bundles_post_ra>
// kernel: reference_fill_forward.1
= control target key start
LH: loop header
LB: loop body
LE: loop exit
PB: predicated region body
PF: predicated region fallthrough
CT: control target
= control target key end

     0   :  { %vm419_vm0 = vcmask 48128   ;;  %v949_v40 = vmov 6   ;;  %vm436_vm1 = vcmask 1045504   ;;  %s950_s19 = smov 32   ;;  %vm952_vm2 = vmmov 0   ;;  %s954_s20 = smov 96   ;;  %s1134_s1 = inlined_call_operand.vmem [shape: bf16[512,64], index: 1, kind: input, shape index: {}]   ;;  %s1135_s0 = inlined_call_operand.vmem [shape: bf16[7,512], index: 0, kind: input, shape index: {}]   ;;  %s1136_s3 = inlined_call_operand.vmem [shape: f32[67,33], index: 3, kind: input, shape index: {}]   ;;  %s1137_s2 = inlined_call_operand.vmem [shape: bf16[32,128], index: 2, kind: input, shape index: {}]   ;;  %s1138_s4 = inlined_call_operand.vmem [shape: f32[3,128], index: 4, kind: output, shape index: {}]  }
   0x1   :  { %v911_v0 = vld [vmem:[%s1134_s1 + $0x40] sm:$0xff]   ;;  %v915_v4 = vld [vmem:[%s1134_s1 + $0x48] sm:$0xff]   ;;  %v919_v8 = vld [vmem:[%s1134_s1 + $0x50] sm:$0xff]   ;;  %909 = vset.pattern.permute.xlu1 %v949_v40  ;;  %908 = vset.pattern.permute.xlu0 %v949_v40  ;;  %v951_v40 = vmov 0.0|0.0   ;;  %vm614_vm3 = vcmask 261120  }
   0x2   :  { %v912_v1 = vld [vmem:[%s1134_s1 + $0xc0] sm:$0xff]   ;;  %801 = vmatprep.subr.bf16.mxu0 %v911_v0  ;;  %v916_v5 = vld [vmem:[%s1134_s1 + $0xc8] sm:$0xff]   ;;  %v920_v9 = vld [vmem:[%s1134_s1 + $0xd0] sm:$0xff]  }
   0x3   :  { %v913_v2 = vld [vmem:[%s1134_s1] sm:$0xff]   ;;  %823 = vmatprep.subr.bf16.mxu1 %v912_v1  ;;  %v917_v6 = vld [vmem:[%s1134_s1 + $0x8] sm:$0xff]   ;;  %v921_v10 = vld [vmem:[%s1134_s1 + $0x10] sm:$0xff]  }
   0x4   :  { %v914_v3 = vld [vmem:[%s1134_s1 + $0x80] sm:$0xff]   ;;  %802 = vmatpush3.bf16.msra.mxu0 %v913_v2  ;;  %v918_v7 = vld [vmem:[%s1134_s1 + $0x88] sm:$0xff]   ;;  %v922_v11 = vld [vmem:[%s1134_s1 + $0x90] sm:$0xff]  }
   0x5   :  { %824 = vmatpush3.bf16.msra.mxu1 %v914_v3  ;;  %803 = vmatprep.subr.bf16.mxu0 %v915_v4  ;;  %v923_v12 = vld [vmem:[%s1134_s1 + $0x58] sm:$0xff]   ;;  %v927_v16 = vld [vmem:[%s1134_s1 + $0x60] sm:$0xff]   ;;  %v931_v20 = vld [vmem:[%s1134_s1 + $0x68] sm:$0xff]  }
   0x6   :  { %825 = vmatprep.subr.bf16.mxu1 %v916_v5  ;;  %v924_v13 = vld [vmem:[%s1134_s1 + $0xd8] sm:$0xff]   ;;  %v928_v17 = vld [vmem:[%s1134_s1 + $0xe0] sm:$0xff]   ;;  %v932_v21 = vld [vmem:[%s1134_s1 + $0xe8] sm:$0xff]  }
   0x7   :  { %v925_v14 = vld [vmem:[%s1134_s1 + $0x18] sm:$0xff]   ;;  %v929_v18 = vld [vmem:[%s1134_s1 + $0x20] sm:$0xff]   ;;  %v933_v22 = vld [vmem:[%s1134_s1 + $0x28] sm:$0xff]  }
   0x8   :  { %804 = vmatpush3.bf16.msra.mxu0 %v917_v6  ;;  %v926_v15 = vld [vmem:[%s1134_s1 + $0x98] sm:$0xff]   ;;  %v930_v19 = vld [vmem:[%s1134_s1 + $0xa0] sm:$0xff]   ;;  %v934_v23 = vld [vmem:[%s1134_s1 + $0xa8] sm:$0xff]  }
   0x9   :  { %826 = vmatpush3.bf16.msra.mxu1 %v918_v7  ;;  %805 = vmatprep.subr.bf16.mxu0 %v919_v8  ;;  %v935_v24 = vld [vmem:[%s1134_s1 + $0x70] sm:$0xff]   ;;  %v939_v28 = vld [vmem:[%s1134_s1 + $0x78] sm:$0xff]   ;;  %v18_v32 = vld [vmem:[%s1135_s0] sm:$0xff] }
   0xa   :  { %827 = vmatprep.subr.bf16.mxu1 %v920_v9  ;;  %v936_v25 = vld [vmem:[%s1134_s1 + $0xf0] sm:$0xff]   ;;  %v940_v29 = vld [vmem:[%s1134_s1 + $0xf8] sm:$0xff]   ;;  %v19_v33 = vld [vmem:[%s1135_s0 + $0x8] sm:$0xff]  ;;  %v752_v34 = vcombine.low %v18_v32, %v18_v32  ;;  %v753_v35 = vcombine.high %v18_v32, %v18_v32 }
   0xb   :  { %v937_v26 = vld [vmem:[%s1134_s1 + $0x30] sm:$0xff]   ;;  %v941_v30 = vld [vmem:[%s1134_s1 + $0x38] sm:$0xff]   ;;  %v754_v36 = vcombine.low %v19_v33, %v19_v33  ;;  %v755_v37 = vcombine.high %v19_v33, %v19_v33  ;;  %v370_v38 = vld [vmem:[%s1136_s3] sm:$0xff] }
   0xc   :  { %806 = vmatpush3.bf16.msra.mxu0 %v921_v10  ;;  %v938_v27 = vld [vmem:[%s1134_s1 + $0xb0] sm:$0xff]   ;;  %v942_v31 = vld [vmem:[%s1134_s1 + $0xb8] sm:$0xff]   ;;  %322 = vmatprep.mubr.bf16.mxu0 %v753_v35  ;;  %v374_v39 = vld [vmem:[%s1136_s3 + $0x20] sm:$0xff] }
   0xd   :  { %828 = vmatpush3.bf16.msra.mxu1 %v922_v11  ;;  %807 = vmatprep.subr.bf16.mxu0 %v923_v12  ;;  %v371_v41 = vld [vmem:[%s1136_s3 + $0x8] sm:$0xff]  ;;  %v372_v43 = vld [vmem:[%s1136_s3 + $0x10] sm:$0xff]  ;;  %v373_v44 = vld [vmem:[%s1136_s3 + $0x18] sm:$0xff] }
   0xe   :  { %829 = vmatprep.subr.bf16.mxu1 %v924_v13  ;;  %362 = vmatprep.mubr.bf16.mxu1 %v755_v37  ;;  %v375_v42 = vld [vmem:[%s1136_s3 + $0x28] sm:$0xff]  ;;  %v376_v45 = vld [vmem:[%s1136_s3 + $0x30] sm:$0xff]  ;;  %v377_v46 = vld [vmem:[%s1136_s3 + $0x38] sm:$0xff] }
   0xf   :  { %401 = vperm.xlu1 %909, %v374_v39   ;;  %381 = vperm.xlu0 %908, %v370_v38  }
  0x10   :  { %808 = vmatpush3.bf16.msra.mxu0 %v925_v14 }
  0x11   :  { %830 = vmatpush3.bf16.msra.mxu1 %v926_v15  ;;  %809 = vmatprep.subr.bf16.mxu0 %v927_v16 }
  0x12   :  { %831 = vmatprep.subr.bf16.mxu1 %v928_v17 }
  0x13   :  { %406 = vperm.xlu1 %909, %v375_v42   ;;  %386 = vperm.xlu0 %908, %v371_v41  }
  0x14   :  { %810 = vmatpush3.bf16.msra.mxu0 %v929_v18 }
  0x15   :  { %832 = vmatpush3.bf16.msra.mxu1 %v930_v19  ;;  %811 = vmatprep.subr.bf16.mxu0 %v931_v20 }
  0x16   :  { %833 = vmatprep.subr.bf16.mxu1 %v932_v21 }
  0x17   :  { %396 = vperm.xlu1 %909, %v373_v44   ;;  %391 = vperm.xlu0 %908, %v372_v43  }
  0x18   :  { %812 = vmatpush3.bf16.msra.mxu0 %v933_v22 }
  0x19   :  { %834 = vmatpush3.bf16.msra.mxu1 %v934_v23  ;;  %813 = vmatprep.subr.bf16.mxu0 %v935_v24 }
  0x1a   :  { %835 = vmatprep.subr.bf16.mxu1 %v936_v25 }
  0x1b   :  { %416 = vperm.xlu1 %909, %v377_v46   ;;  %411 = vperm.xlu0 %908, %v376_v45  }
  0x1c   :  { %814 = vmatpush3.bf16.msra.mxu0 %v937_v26 }
  0x1d   :  { %836 = vmatpush3.bf16.msra.mxu1 %v938_v27  ;;  %815 = vmatprep.subr.bf16.mxu0 %v939_v28 }
  0x1e   :  { %837 = vmatprep.subr.bf16.mxu1 %v940_v29 }
  0x20   :  { %816 = vmatpush3.bf16.msra.mxu0 %v941_v30 }
  0x21   :  { %838 = vmatpush3.bf16.msra.mxu1 %v942_v31 }
  0x22   :  { %895 = vmatprep.subr.bf16.mxu1 %v951_v40 }
  0x23   :  { %323 = vmatmul.mubr.bf16.vlgmr.msra.gmra.mrb[0].mxu0 %v752_v34 }
  0x24   :  { %363 = vmatmul.mubr.bf16.vlgmr.msra.gmra.mrb[0].mxu1 %v754_v36  ;;  %864 = vmatprep.mubr.msk.f32.mxu0 %vm419_vm0, %v370_v38  ;;  %v565_v38 = vlaneseq }
  0x8e   :  { %v402_v58 = vpop.permute.xlu1 %401  ;;  %v382_v59 = vpop.permute.xlu0 %381 }
  0x92   :  { %v407_v60 = vpop.permute.xlu1 %406  ;;  %v387_v62 = vpop.permute.xlu0 %386 }
  0x96   :  { %v397_v3 = vpop.permute.xlu1 %396  ;;  %v392_v5 = vpop.permute.xlu0 %391 }
  0x9a   :  { %v417_v15 = vpop.permute.xlu1 %416  ;;  %v412_v20 = vpop.permute.xlu0 %411 }
  0xf6   :  { %v817_v47 = vpop.f32.mrb[0].mxu0 }
  0xf7   :  { %v839_v48 = vpop.f32.mrb[0].mxu1  ;;  %v818_v49 = vpop.f32.mrb[1].mxu0 }
  0xf8   :  { %v840_v50 = vpop.f32.mrb[1].mxu1  ;;  %v819_v51 = vadd.f32 %v818_v49, %v817_v47  ;;  %v820_v53 = vpop.f32.mrb[2].mxu0 }
  0xf9   :  { %v841_v52 = vadd.f32 %v840_v50, %v839_v48  ;;  %v842_v54 = vpop.f32.mrb[2].mxu1  ;;  %v821_v55 = vpop.f32.mrb[3].mxu0  ;;  %v955_v48 = vmov 32   ;;  %v378_v53 = vld [vmem:[%s1136_s3 + $0x40] sm:$0x7] }
  0xfa   :  { %v843_v56 = vpop.f32.mrb[3].mxu1  ;;  %910 = vset.pattern.permute.xlu0 %v955_v48 }
  0xfb   :  { %v1108_v57 = vadd.f32 %v841_v52, %v819_v51 }
  0xfd   :  { %862 = vmatprep.subr.msk.mxu0 %vm436_vm1, %v1108_v57 }
  0xfe   :  { %863 = vmatpush3.msk.msra.mxu0 %vm436_vm1, %v1108_v57 }
  0xff   :  { %865 = vmatmul.mubr.msk.f32.vlgmr.msra.gmra.mrb[4].mxu0 %vm419_vm0, %v371_v41 }
 0x100   :  { %867 = vmatprep.mubr.msk.f32.mxu0 %vm419_vm0, %v372_v43 }
 0x103   :  { %868 = vmatmul.mubr.msk.f32.gmra.mrb[6].mxu0 %vm419_vm0, %v373_v44  ;;  %v953_v44 = vmov 0.0  }
 0x104   :  { %870 = vmatprep.mubr.msk.f32.mxu0 %vm419_vm0, %v374_v39  ;;  %v566_v39 = vshrl.u32 %v565_v38, 7  ;;  %884 = vmatprep.mubr.msk.f32.mxu1 %vm952_vm2, %v953_v44 }
 0x106   :  { %v567_v41 = vsub.s32 6, %v566_v39 }
 0x107   :  { %871 = vmatmul.mubr.msk.f32.gmra.mrb[8].mxu0 %vm419_vm0, %v375_v42 }
 0x108   :  { %873 = vmatprep.mubr.msk.f32.mxu0 %vm419_vm0, %v376_v45  ;;  %v568_v42 = vrot.slane %v1108_v57, %v567_v41 }
 0x10b   :  { %874 = vmatmul.mubr.msk.f32.gmra.mrb[10].mxu0 %vm419_vm0, %v377_v46 }
 0x1d2   :  { %v866_v61 = vpop.f32.mrb[4].mxu0 }
 0x1d3   :  { %v506_v63 = vpop.f32.mrb[5].mxu0  ;;  %v512_v1 = vadd.f32 %v866_v61, %v387_v62 }
 0x1d4   :  { %v507_v4 = vadd.f32 %v506_v63, %v382_v59 }
 0x1d5   :  { %v546_v7 = vmul.f32 0.2, %v512_v1 }
 0x1d6   :  { %v869_v0 = vpop.f32.mrb[6].mxu0  ;;  %v545_v11 = vmul.f32 0.2, %v507_v4 }
 0x1d7   :  { %v516_v2 = vpop.f32.mrb[7].mxu0  ;;  %v522_v8 = vadd.f32 %v869_v0, %v397_v3  ;;  %v554_v18 = vmax.f32 %v512_v1, %v546_v7  ;;  %v947_v0 = vld [vmem:[%s1137_s2] sm:$0xff]   ;;  %v948_v1 = vld [vmem:[%s1137_s2 + $0x8] sm:$0xff]  }
 0x1d8   :  { %v517_v12 = vadd.f32 %v516_v2, %v392_v5  ;;  %v553_v24 = vmax.f32 %v507_v4, %v545_v11 }
 0x1d9   :  { %v548_v19 = vmul.f32 0.2, %v522_v8 }
 0x1da   :  { %v872_v6 = vpop.f32.mrb[8].mxu0  ;;  %v547_v25 = vmul.f32 0.2, %v517_v12 }
 0x1db   :  { %v532_v9 = vadd.f32 %v872_v6, %v407_v60  ;;  %v526_v10 = vpop.f32.mrb[9].mxu0  ;;  %v556_v32 = vmax.f32 %v522_v8, %v548_v19 }
 0x1dc   :  { %v527_v13 = vadd.f32 %v526_v10, %v402_v58  ;;  %v555_v34 = vmax.f32 %v517_v12, %v547_v25 }
 0x1dd   :  { %v550_v14 = vmul.f32 0.2, %v532_v9 }
 0x1de   :  { %v549_v16 = vmul.f32 0.2, %v527_v13  ;;  %v875_v17 = vpop.f32.mrb[10].mxu0 }
 0x1df   :  { %v558_v21 = vmax.f32 %v532_v9, %v550_v14  ;;  %v542_v22 = vadd.f32 %v875_v17, %v417_v15  ;;  %v536_v23 = vpop.f32.mrb[11].mxu0 }
 0x1e0   :  { %v557_v26 = vmax.f32 %v527_v13, %v549_v16  ;;  %v537_v27 = vadd.f32 %v536_v23, %v412_v20 }
 0x1e1   :  { %v552_v28 = vmul.f32 0.2, %v542_v22  ;;  %v562_v29 = vsub.f32 %v558_v21, %v554_v18 }
 0x1e2   :  { %v551_v30 = vmul.f32 0.2, %v537_v27  ;;  %v561_v31 = vsub.f32 %v557_v26, %v553_v24 }
 0x1e3   :  { %v560_v33 = vmax.f32 %v542_v22, %v552_v28  ;;  %575 = vrot.lane.b32.xlu1 %v562_v29, %s950_s19 }
 0x1e4   :  { %v559_v35 = vmax.f32 %v537_v27, %v551_v30  ;;  %573 = vrot.lane.b32.xlu0 %v561_v31, %s950_s19 }
 0x1e5   :  { %v564_v36 = vsub.f32 %v560_v33, %v556_v32 }
 0x1e6   :  { %v563_v37 = vsub.f32 %v559_v35, %v555_v34 }
 0x1e7   :  { %579 = vrot.lane.b32.xlu1 %v564_v36, %s950_s19 }
 0x1e8   :  { %577 = vrot.lane.b32.xlu0 %v563_v37, %s950_s19 }
 0x255   :  { %v576_v43 = vpop.permute.xlu1 %575 }
 0x256   :  { %v586_v45 = vmul.f32 %v576_v43, %v568_v42  ;;  %v574_v46 = vpop.permute.xlu0 %573 }
 0x257   :  { %v585_v47 = vmul.f32 %v574_v46, %v568_v42 }
 0x258   :  { %595 = vrot.lane.b32.xlu1 %v586_v45, %s954_s20 }
 0x259   :  { %v580_v49 = vpop.permute.xlu1 %579  ;;  %593 = vrot.lane.b32.xlu0 %v585_v47, %s954_s20 }
 0x25a   :  { %v588_v50 = vmul.f32 %v580_v49, %v568_v42  ;;  %v578_v51 = vpop.permute.xlu0 %577 }
 0x25b   :  { %v587_v52 = vmul.f32 %v578_v51, %v568_v42 }
 0x25c   :  { %599 = vrot.lane.b32.xlu1 %v588_v50, %s954_s20 }
 0x25d   :  { %597 = vrot.lane.b32.xlu0 %v587_v52, %s954_s20 }
 0x261   :  { %611 = vperm.xlu0 %910, %v378_v53  }
 0x2ca   :  { %v596_v54 = vpop.permute.xlu1 %595 }
 0x2cb   :  { %v606_v55 = vadd.f32 %v596_v54, %v554_v18  ;;  %v594_v56 = vpop.permute.xlu0 %593 }
 0x2cc   :  { %v605_v57 = vadd.f32 %v594_v56, %v553_v24 }
 0x2ce   :  { %v896_v58 = vpack.c.bf16 %v606_v55, %v605_v57  ;;  %v600_v59 = vpop.permute.xlu1 %599 }
 0x2cf   :  { %v608_v60 = vadd.f32 %v600_v59, %v556_v32  ;;  %v598_v61 = vpop.permute.xlu0 %597 }
 0x2d0   :  { %v607_v62 = vadd.f32 %v598_v61, %v555_v34  ;;  %897 = vmatpush3.bf16.msra.mxu1 %v896_v58 }
 0x2d1   :  { %898 = vmatprep.subr.bf16.mxu1 %v951_v40 }
 0x2d2   :  { %v899_v63 = vpack.c.bf16 %v608_v60, %v607_v62 }
 0x2d4   :  { %900 = vmatpush3.bf16.msra.mxu1 %v899_v63 }
 0x2d5   :  { %887 = vmatprep.subr.bf16.mxu1 %v953_v44 }
 0x2d7   :  { %885 = vmatmul.mubr.msk.f32.vlgmr.msra.gmra.mrb[4].mxu1 %vm614_vm3, %v378_v53 }
 0x2d8   :  { %888 = vmatpush3.bf16.msra.mxu1 %v947_v0  ;;  %891 = vmatprep.mubr.msk.bf16.mxu1 %vm952_vm2, %v953_v44 }
 0x2d9   :  { %889 = vmatprep.subr.bf16.mxu1 %v953_v44 }
 0x2dc   :  { %890 = vmatpush3.bf16.msra.mxu1 %v948_v1 }
 0x2e0   :  { %v612_v2 = vpop.permute.xlu0 %611 }
 0x3aa   :  { %v683_v3 = vpop.f32.mrb[4].mxu1 }
 0x3ab   :  { %v684_v4 = vadd.f32 %v683_v3, %v612_v2  ;;  %v886_v5 = vpop.f32.mrb[5].mxu1 }
 0x3ad   :  { %v687_v6 = vpack.c.bf16 %v684_v4, %v684_v4 }
 0x3af   :  { %892 = vmatmul.mubr.msk.bf16.vlgmr.msra.gmra.mrb[8].mxu1 %vm614_vm3, %v687_v6 }
 0x482   :  { %v741_v7 = vpop.f32.mrb[8].mxu1 }
 0x483   :  { %747 = vst [vmem:[%s1138_s4] sm:$0x7] %v741_v7  ;;  %v893_v8 = vpop.f32.mrb[9].mxu1 }
 0x484   :  { %v744_v9 = vpop.f32.mrb[10].mxu1 }
 0x485   :  { %v894_v10 = vpop.f32.mrb[11].mxu1 }

</bundles_post_ra>
